<compile_context>
chip_gen: v5e
topology: v5e:2x2
jax: 0.10.0
libtpu: 0.0.40
codegen_flags: <defaults>
</compile_context>

<pallas_src>
import jax
import jax.numpy as jnp
from jax.experimental import pallas as pl
from jax.experimental.pallas import tpu as pltpu

_LANE = 128
_SUBLANE = 8


def _round_up(n, m):
    return ((n + m - 1) // m) * m


def _pad2(a, shape):
    pads = [(0, s - d) for d, s in zip(a.shape, shape)]
    return jnp.pad(a, pads)


def _encoder_kernel(x_ref, w1_ref, b1_ref, w2_ref, b2_ref, w3_ref, b3_ref,
                    out_ref):
    # x tile: (TM, D_pad) bf16; weights bf16; biases f32.
    x = x_ref[...]

    h1 = jnp.dot(x, w1_ref[...], preferred_element_type=jnp.float32)
    h1 = jnp.maximum(h1 + b1_ref[...], 0.0)

    h2 = jnp.dot(h1.astype(w2_ref.dtype), w2_ref[...],
                 preferred_element_type=jnp.float32)
    h2 = jnp.maximum(h2 + b2_ref[...], 0.0)

    h3 = jnp.dot(h2.astype(w3_ref.dtype), w3_ref[...],
                 preferred_element_type=jnp.float32)
    h3 = jnp.maximum(h3 + b3_ref[...], 0.0)

    out_ref[...] = h3.astype(out_ref.dtype)


def encoder_forward(x, params, *, tm_max=256):
    """x: [B, C, H, W] (or already-flat [B, D]). Returns [B, latent_dims] f32."""
    # Glue: flatten like torch.flatten(x, start_dim=1) on contiguous NCHW.
    x2d = x.reshape(x.shape[0], -1)
    B, D = x2d.shape

    w1, b1, w2, b2, w3, b3 = (params["w1"], params["b1"], params["w2"],
                              params["b2"], params["w3"], params["b3"])
    Hd = w1.shape[1]
    L = w3.shape[1]

    # Lane/sublane padding.
    D_pad = _round_up(D, _LANE)
    H_pad = _round_up(Hd, _LANE)
    L_pad = _round_up(L, _LANE)
    TM = min(tm_max, _round_up(B, _SUBLANE))
    B_pad = _round_up(B, TM)

    # bf16 MXU inputs (zero padding preserves the math exactly).
    xp = _pad2(x2d.astype(jnp.bfloat16), (B_pad, D_pad))
    w1p = _pad2(w1.astype(jnp.bfloat16), (D_pad, H_pad))
    w2p = _pad2(w2.astype(jnp.bfloat16), (H_pad, H_pad))
    w3p = _pad2(w3.astype(jnp.bfloat16), (H_pad, L_pad))
    # Biases stay f32: add + ReLU happen on the f32 accumulator.
    b1p = _pad2(b1.reshape(1, -1).astype(jnp.float32), (1, H_pad))
    b2p = _pad2(b2.reshape(1, -1).astype(jnp.float32), (1, H_pad))
    b3p = _pad2(b3.reshape(1, -1).astype(jnp.float32), (1, L_pad))

    grid = (B_pad // TM,)

    out_pad = pl.pallas_call(
        _encoder_kernel,
        out_shape=jax.ShapeDtypeStruct((B_pad, L_pad), jnp.float32),
        grid=grid,
        in_specs=[
            pl.BlockSpec((TM, D_pad), lambda i: (i, 0)),      # x tile
            pl.BlockSpec((D_pad, H_pad), lambda i: (0, 0)),   # w1 (resident)
            pl.BlockSpec((1, H_pad), lambda i: (0, 0)),       # b1
            pl.BlockSpec((H_pad, H_pad), lambda i: (0, 0)),   # w2
            pl.BlockSpec((1, H_pad), lambda i: (0, 0)),       # b2
            pl.BlockSpec((H_pad, L_pad), lambda i: (0, 0)),   # w3
            pl.BlockSpec((1, L_pad), lambda i: (0, 0)),       # b3
        ],
        out_specs=pl.BlockSpec((TM, L_pad), lambda i: (i, 0)),
        compiler_params=pltpu.CompilerParams(
            dimension_semantics=("parallel",)),
    )(xp, w1p, b1p, w2p, b2p, w3p, b3p)

    return out_pad[:B, :L]


def init_encoder_params(key, input_dims, hidden_dims, latent_dims):
    """Deterministic init mimicking nn.Linear (uniform(-1/sqrt(fan_in), ...)).

    Weights are stored pre-transposed as [in, out]."""
    ks = jax.random.split(key, 6)

    def linear(kw, kb, fan_in, fan_out):
        bound = 1.0 / jnp.sqrt(fan_in)
        w = jax.random.uniform(kw, (fan_in, fan_out), jnp.float32,
                               minval=-bound, maxval=bound)
        b = jax.random.uniform(kb, (fan_out,), jnp.float32,
                               minval=-bound, maxval=bound)
        return w, b

    w1, b1 = linear(ks[0], ks[1], input_dims, hidden_dims)
    w2, b2 = linear(ks[2], ks[3], hidden_dims, hidden_dims)
    w3, b3 = linear(ks[4], ks[5], hidden_dims, latent_dims)
    return {"w1": w1, "b1": b1, "w2": w2, "b2": b2, "w3": w3, "b3": b3}


if __name__ == "__main__":
    key = jax.random.PRNGKey(0)
    kx, kp = jax.random.split(key)

    # Small shapes consistent with the module: image-like input flattened.
    B, C, H, W = 2, 4, 16, 16
    input_dims = C * H * W          # 1024
    hidden_dims = 32
    latent_dims = 8

    x = jax.random.normal(kx, (B, C, H, W), jnp.float32)
    params = init_encoder_params(kp, input_dims, hidden_dims, latent_dims)

    out = jax.block_until_ready(encoder_forward(x, params))

    # Reference with matching precision (bf16 MXU inputs, f32 accumulation).
    xf = x.reshape(B, -1)

    def lin_relu(a, w, b):
        acc = jnp.dot(a.astype(jnp.bfloat16), w.astype(jnp.bfloat16),
                      preferred_element_type=jnp.float32)
        return jnp.maximum(acc + b, 0.0)

    h1 = lin_relu(xf, params["w1"], params["b1"])
    h2 = lin_relu(h1, params["w2"], params["b2"])
    ref = lin_relu(h2, params["w3"], params["b3"])

    assert out.shape == (B, latent_dims)
    assert jnp.allclose(out, ref, atol=5e-3, rtol=5e-3)

    print("KERNEL_OK")
</pallas_src>

<mosaic_0001>
module attributes {stable_mosaic.version = 11 : i64} {
  func.func @_encoder_kernel(%arg0: i32, %arg1: memref<8x1024xbf16, #tpu.memory_space<vmem>>, %arg2: memref<1024x128xbf16, #tpu.memory_space<vmem>>, %arg3: memref<1x128xf32, #tpu.memory_space<vmem>>, %arg4: memref<128x128xbf16, #tpu.memory_space<vmem>>, %arg5: memref<1x128xf32, #tpu.memory_space<vmem>>, %arg6: memref<128x128xbf16, #tpu.memory_space<vmem>>, %arg7: memref<1x128xf32, #tpu.memory_space<vmem>>, %arg8: memref<8x128xf32, #tpu.memory_space<vmem>>) attributes {dimension_semantics = [#tpu.dimension_semantics<parallel>], iteration_bounds = array<i64: 1>, scalar_prefetch = 0 : i64, scratch_operands = 0 : i64, tpu.core_type = #tpu.core_type<tc>, window_params = [{transform_indices = @transform_0, window_bounds = array<i64: 8, 1024>}, {pipeline_mode = #tpu.pipeline_mode<synchronous>, transform_indices = @transform_1, window_bounds = array<i64: 1024, 128>}, {pipeline_mode = #tpu.pipeline_mode<synchronous>, transform_indices = @transform_2, window_bounds = array<i64: 1, 128>}, {pipeline_mode = #tpu.pipeline_mode<synchronous>, transform_indices = @transform_3, window_bounds = array<i64: 128, 128>}, {pipeline_mode = #tpu.pipeline_mode<synchronous>, transform_indices = @transform_4, window_bounds = array<i64: 1, 128>}, {pipeline_mode = #tpu.pipeline_mode<synchronous>, transform_indices = @transform_5, window_bounds = array<i64: 128, 128>}, {pipeline_mode = #tpu.pipeline_mode<synchronous>, transform_indices = @transform_6, window_bounds = array<i64: 1, 128>}, {transform_indices = @transform_7, window_bounds = array<i64: 8, 128>}]} {
    %c0 = arith.constant 0 : index
    %c0_0 = arith.constant 0 : index
    %0 = vector.load %arg1[%c0, %c0_0] : memref<8x1024xbf16, #tpu.memory_space<vmem>>, vector<8x1024xbf16>
    %c0_1 = arith.constant 0 : index
    %c0_2 = arith.constant 0 : index
    %1 = vector.load %arg2[%c0_1, %c0_2] : memref<1024x128xbf16, #tpu.memory_space<vmem>>, vector<1024x128xbf16>
    %cst = arith.constant dense<0.000000e+00> : vector<8x128xf32>
    %2 = tpu.matmul %0, %1, %cst {dimension_numbers = #tpu.dot_dimension_numbers<[1], [0], [0], [1], [0, 0, 1, 1], [], []>} : vector<8x1024xbf16>, vector<1024x128xbf16>, vector<8x128xf32> -> vector<8x128xf32>
    %c0_3 = arith.constant 0 : index
    %c0_4 = arith.constant 0 : index
    %3 = vector.load %arg3[%c0_3, %c0_4] : memref<1x128xf32, #tpu.memory_space<vmem>>, vector<1x128xf32>
    %4 = vector.broadcast %3 : vector<1x128xf32> to vector<8x128xf32>
    %5 = arith.addf %2, %4 : vector<8x128xf32>
    %cst_5 = arith.constant 0.000000e+00 : f32
    %6 = vector.broadcast %cst_5 : f32 to vector<8x128xf32>
    %7 = arith.maximumf %5, %6 : vector<8x128xf32>
    %8 = arith.truncf %7 : vector<8x128xf32> to vector<8x128xbf16>
    %c0_6 = arith.constant 0 : index
    %c0_7 = arith.constant 0 : index
    %9 = vector.load %arg4[%c0_6, %c0_7] : memref<128x128xbf16, #tpu.memory_space<vmem>>, vector<128x128xbf16>
    %cst_8 = arith.constant dense<0.000000e+00> : vector<8x128xf32>
    %10 = tpu.matmul %8, %9, %cst_8 {dimension_numbers = #tpu.dot_dimension_numbers<[1], [0], [0], [1], [0, 0, 1, 1], [], []>} : vector<8x128xbf16>, vector<128x128xbf16>, vector<8x128xf32> -> vector<8x128xf32>
    %c0_9 = arith.constant 0 : index
    %c0_10 = arith.constant 0 : index
    %11 = vector.load %arg5[%c0_9, %c0_10] : memref<1x128xf32, #tpu.memory_space<vmem>>, vector<1x128xf32>
    %12 = vector.broadcast %11 : vector<1x128xf32> to vector<8x128xf32>
    %13 = arith.addf %10, %12 : vector<8x128xf32>
    %cst_11 = arith.constant 0.000000e+00 : f32
    %14 = vector.broadcast %cst_11 : f32 to vector<8x128xf32>
    %15 = arith.maximumf %13, %14 : vector<8x128xf32>
    %16 = arith.truncf %15 : vector<8x128xf32> to vector<8x128xbf16>
    %c0_12 = arith.constant 0 : index
    %c0_13 = arith.constant 0 : index
    %17 = vector.load %arg6[%c0_12, %c0_13] : memref<128x128xbf16, #tpu.memory_space<vmem>>, vector<128x128xbf16>
    %cst_14 = arith.constant dense<0.000000e+00> : vector<8x128xf32>
    %18 = tpu.matmul %16, %17, %cst_14 {dimension_numbers = #tpu.dot_dimension_numbers<[1], [0], [0], [1], [0, 0, 1, 1], [], []>} : vector<8x128xbf16>, vector<128x128xbf16>, vector<8x128xf32> -> vector<8x128xf32>
    %c0_15 = arith.constant 0 : index
    %c0_16 = arith.constant 0 : index
    %19 = vector.load %arg7[%c0_15, %c0_16] : memref<1x128xf32, #tpu.memory_space<vmem>>, vector<1x128xf32>
    %20 = vector.broadcast %19 : vector<1x128xf32> to vector<8x128xf32>
    %21 = arith.addf %18, %20 : vector<8x128xf32>
    %cst_17 = arith.constant 0.000000e+00 : f32
    %22 = vector.broadcast %cst_17 : f32 to vector<8x128xf32>
    %23 = arith.maximumf %21, %22 : vector<8x128xf32>
    %c0_18 = arith.constant 0 : index
    %c0_19 = arith.constant 0 : index
    %24 = vector.load %arg8[%c0_18, %c0_19] : memref<8x128xf32, #tpu.memory_space<vmem>>, vector<8x128xf32>
    tpu.vector_store %arg8[%c0_18, %c0_19], %23 {strides = array<i32>} : memref<8x128xf32, #tpu.memory_space<vmem>>, vector<8x128xf32>,
    return
  }
  func.func @transform_0(%arg0: i32) -> (i32, i32) {
    %c0_i32 = arith.constant 0 : i32
    %c0_i32_0 = arith.constant 0 : i32
    return %arg0, %c0_i32 : i32, i32
  }
  func.func @transform_1(%arg0: i32) -> (i32, i32) {
    %c0_i32 = arith.constant 0 : i32
    %c0_i32_0 = arith.constant 0 : i32
    %c0_i32_1 = arith.constant 0 : i32
    return %c0_i32, %c0_i32_0 : i32, i32
  }
  func.func @transform_2(%arg0: i32) -> (i32, i32) {
    %c0_i32 = arith.constant 0 : i32
    %c0_i32_0 = arith.constant 0 : i32
    %c0_i32_1 = arith.constant 0 : i32
    return %c0_i32, %c0_i32_0 : i32, i32
  }
  func.func @transform_3(%arg0: i32) -> (i32, i32) {
    %c0_i32 = arith.constant 0 : i32
    %c0_i32_0 = arith.constant 0 : i32
    %c0_i32_1 = arith.constant 0 : i32
    return %c0_i32, %c0_i32_0 : i32, i32
  }
  func.func @transform_4(%arg0: i32) -> (i32, i32) {
    %c0_i32 = arith.constant 0 : i32
    %c0_i32_0 = arith.constant 0 : i32
    %c0_i32_1 = arith.constant 0 : i32
    return %c0_i32, %c0_i32_0 : i32, i32
  }
  func.func @transform_5(%arg0: i32) -> (i32, i32) {
    %c0_i32 = arith.constant 0 : i32
    %c0_i32_0 = arith.constant 0 : i32
    %c0_i32_1 = arith.constant 0 : i32
    return %c0_i32, %c0_i32_0 : i32, i32
  }
  func.func @transform_6(%arg0: i32) -> (i32, i32) {
    %c0_i32 = arith.constant 0 : i32
    %c0_i32_0 = arith.constant 0 : i32
    %c0_i32_1 = arith.constant 0 : i32
    return %c0_i32, %c0_i32_0 : i32, i32
  }
  func.func @transform_7(%arg0: i32) -> (i32, i32) {
    %c0_i32 = arith.constant 0 : i32
    %c0_i32_0 = arith.constant 0 : i32
    return %arg0, %c0_i32 : i32, i32
  }
}

</mosaic_0001>

<bundles_post_ra>
// kernel: tpu_custom_call.1
= control target key start
LH: loop header
LB: loop body
LE: loop exit
PB: predicated region body
PF: predicated region fallthrough
CT: control target
= control target key end

     0   :  { %12 = vsyncpa [#allocation3], 0  ;;  %s1536_s0 = inlined_call_operand.hbm [shape: bf16[8,1024], index: 0, kind: input, shape index: {}]   ;;  %s1537_s1 = inlined_call_operand.hbm [shape: bf16[1024,128], index: 1, kind: input, shape index: {}]   ;;  %s1538_s2 = inlined_call_operand.vmem [shape: f32[1,128], index: 2, kind: input, shape index: {}]   ;;  %s1539_s3 = inlined_call_operand.hbm [shape: bf16[128,128], index: 3, kind: input, shape index: {}]   ;;  %s1540_s4 = inlined_call_operand.vmem [shape: f32[1,128], index: 4, kind: input, shape index: {}]   ;;  %s1541_s5 = inlined_call_operand.hbm [shape: bf16[128,128], index: 5, kind: input, shape index: {}]   ;;  %s1542_s6 = inlined_call_operand.vmem [shape: f32[1,128], index: 6, kind: input, shape index: {}]   ;;  %s1543_s7 = inlined_call_operand.hbm [shape: f32[8,128], index: 7, kind: output, shape index: {}]  }
   0x1   :  { %13 = vsyncpa [#allocation6], 0 }
   0x2   :  { %14 = vsyncpa [#allocation9], 0  ;;  %s31_s26 = sshll.u32 %s1537_s1, 4  ;;  %s32_s26 = int_to_ptr.hbm [resolvable:$true] %s31_s26 }
   0x3   :  { %15 = vsyncpa [#allocation4], 0  ;;  %s1465_s27 = smov [#allocation5]   ;;  %s21_s8 = sshll.u32 %s1536_s0, 4  ;;  %s22_s8 = int_to_ptr.hbm [resolvable:$true] %s21_s8 }
   0x4   :  { %s33_s28 = sshll.u32 %s1465_s27, 4  ;;  %s1466_s9 = smov 64   ;;  %s34_s28 = int_to_ptr.vmem [resolvable:$true] %s33_s28 }
   0x5   :  { %s1467_s10 = smov 4   ;;  %s1468_s11 = smov [#allocation2]  }
   0x6   :  { %39 = dma.hbm_to_vmem [thread:$0]  %s32_s26, 8192, %s34_s28, [#allocation6], %s1466_s9, %s1466_s9, %s1467_s10  }
   0x7   :  { %s23_s12 = sshll.u32 %s1468_s11, 4  ;;  %s46_s15 = sshll.u32 %s1539_s3, 4  ;;  %s24_s12 = int_to_ptr.vmem [resolvable:$true] %s23_s12  ;;  %s47_s15 = int_to_ptr.hbm [resolvable:$true] %s46_s15 }
   0x8   :  { %26 = dma.hbm_to_vmem [thread:$0]  %s22_s8, 512, %s24_s12, [#allocation3]  }
   0x9   :  { %s61_s17 = sshll.u32 %s1541_s5, 4  ;;  %s1469_s18 = smov [#allocation7]   ;;  %s62_s17 = int_to_ptr.hbm [resolvable:$true] %s61_s17 }
   0xa   :  { %s48_s19 = sshll.u32 %s1469_s18, 4  ;;  %s1470_s0 = smov [#allocation8]   ;;  %s49_s19 = int_to_ptr.vmem [resolvable:$true] %s48_s19 }
   0xb   :  { %54 = dma.hbm_to_vmem [thread:$0]  %s47_s15, 1024, %s49_s19, [#allocation6], %s1466_s9, %s1466_s9, %s1467_s10  }
   0xc   :  { %s63_s20 = sshll.u32 %s1470_s0, 4  ;;  %s64_s20 = int_to_ptr.vmem [resolvable:$true] %s63_s20 }
   0xd   :  { %69 = dma.hbm_to_vmem [thread:$0]  %s62_s17, 1024, %s64_s20, [#allocation9], %s1466_s9, %s1466_s9, %s1467_s10  }
   0xe   :  { %1457 = dma.done.wait [#allocation3], 512  }
   0xf   :  { %1458 = vsyncadd [#allocation3], 4294966784 }
  0x10   :  { %1459 = dma.done.wait [#allocation6], 9216  }
  0x11   :  { %1460 = vsyncadd [#allocation6], 4294958080 }
  0x12   :  { %1461 = dma.done.wait [#allocation9], 1024  }
  0x13   :  { %1462 = vsyncadd [#allocation9], 4294966272  ;;  %v1254_v0 = vld [vmem:[#allocation5 + $0x38] sm:$0xff]  ;;  %v1253_v4 = vld [vmem:[#allocation5 + $0x30] sm:$0xff]  ;;  %s1471_s24 = smov [#allocation10]   ;;  %s915_s28 = sshll.u32 %s1543_s7, 4  ;;  %s916_s28 = int_to_ptr.hbm [resolvable:$true] %s915_s28 }
  0x14   :  { %v1262_v1 = vld [vmem:[#allocation5 + $0x78] sm:$0xff]  ;;  %636 = vmatpush.bf16.msra.mxu0 %v1254_v0  ;;  %v1261_v5 = vld [vmem:[#allocation5 + $0x70] sm:$0xff]  ;;  %v1252_v8 = vld [vmem:[#allocation5 + $0x28] sm:$0xff]  ;;  %s913_s25 = sshll.u32 %s1471_s24, 4  ;;  %s914_s25 = int_to_ptr.vmem [resolvable:$true] %s913_s25 }
  0x15   :  { %v1270_v2 = vld [vmem:[#allocation5 + $0xb8] sm:$0xff]  ;;  %649 = vmatpush.bf16.msra.mxu1 %v1262_v1  ;;  %v1269_v6 = vld [vmem:[#allocation5 + $0xb0] sm:$0xff]  ;;  %v1260_v9 = vld [vmem:[#allocation5 + $0x68] sm:$0xff] }
  0x16   :  { %v1278_v3 = vld [vmem:[#allocation5 + $0xf8] sm:$0xff]  ;;  %662 = vmatpush.bf16.msra.mxu2 %v1270_v2  ;;  %v1277_v7 = vld [vmem:[#allocation5 + $0xf0] sm:$0xff]  ;;  %v1268_v10 = vld [vmem:[#allocation5 + $0xa8] sm:$0xff] }
  0x17   :  { %675 = vmatpush.bf16.msra.mxu3 %v1278_v3  ;;  %v1276_v11 = vld [vmem:[#allocation5 + $0xe8] sm:$0xff]  ;;  %v1251_v12 = vld [vmem:[#allocation5 + $0x20] sm:$0xff]  ;;  %v1250_v16 = vld [vmem:[#allocation5 + $0x18] sm:$0xff] }
  0x18   :  { %637 = vmatpush.bf16.msra.mxu0 %v1253_v4  ;;  %v1259_v13 = vld [vmem:[#allocation5 + $0x60] sm:$0xff]  ;;  %v1258_v17 = vld [vmem:[#allocation5 + $0x58] sm:$0xff]  ;;  %v1249_v20 = vld [vmem:[#allocation5 + $0x10] sm:$0xff] }
  0x19   :  { %650 = vmatpush.bf16.msra.mxu1 %v1261_v5  ;;  %v1267_v14 = vld [vmem:[#allocation5 + $0xa0] sm:$0xff]  ;;  %v1266_v18 = vld [vmem:[#allocation5 + $0x98] sm:$0xff]  ;;  %v1257_v21 = vld [vmem:[#allocation5 + $0x50] sm:$0xff] }
  0x1a   :  { %663 = vmatpush.bf16.msra.mxu2 %v1269_v6  ;;  %v1275_v15 = vld [vmem:[#allocation5 + $0xe0] sm:$0xff]  ;;  %v1274_v19 = vld [vmem:[#allocation5 + $0xd8] sm:$0xff]  ;;  %v1265_v22 = vld [vmem:[#allocation5 + $0x90] sm:$0xff] }
  0x1b   :  { %676 = vmatpush.bf16.msra.mxu3 %v1277_v7  ;;  %v1273_v23 = vld [vmem:[#allocation5 + $0xd0] sm:$0xff]  ;;  %v1248_v24 = vld [vmem:[#allocation5 + $0x8] sm:$0xff]  ;;  %v88_v29 = vld [vmem:[#allocation2] sm:$0xff] }
  0x1c   :  { %638 = vmatpush.bf16.msra.mxu0 %v1252_v8  ;;  %v1256_v25 = vld [vmem:[#allocation5 + $0x48] sm:$0xff]  ;;  %v1247_v30 = vld [vmem:[#allocation5] sm:$0xff]  ;;  %v228_v33 = vunpack.c.l.b16 %v88_v29  ;;  %v229_v37 = vunpack.c.h.b16 %v88_v29  ;;  %v1286_v38 = vld [vmem:[#allocation5 + $0x138] sm:$0xff] }
  0x1d   :  { %651 = vmatpush.bf16.msra.mxu1 %v1260_v9  ;;  %v1264_v26 = vld [vmem:[#allocation5 + $0x88] sm:$0xff]  ;;  %v1255_v31 = vld [vmem:[#allocation5 + $0x40] sm:$0xff]  ;;  %v1294_v39 = vld [vmem:[#allocation5 + $0x178] sm:$0xff] }
  0x1e   :  { %664 = vmatpush.bf16.msra.mxu2 %v1268_v10  ;;  %v1272_v27 = vld [vmem:[#allocation5 + $0xc8] sm:$0xff]  ;;  %v1263_v34 = vld [vmem:[#allocation5 + $0x80] sm:$0xff]  ;;  %v1302_v40 = vld [vmem:[#allocation5 + $0x1b8] sm:$0xff]  ;;  %v236_v43 = vpack.c.b16 %v228_v33, %v228_v33  ;;  %v237_v45 = vpack.c.b16 %v229_v37, %v229_v37 }
  0x1f   :  { %677 = vmatpush.bf16.msra.mxu3 %v1276_v11  ;;  %v89_v28 = vld [vmem:[#allocation2 + $0x8] sm:$0xff]  ;;  %v1271_v35 = vld [vmem:[#allocation5 + $0xc0] sm:$0xff]  ;;  %v1310_v41 = vld [vmem:[#allocation5 + $0x1f8] sm:$0xff] }
  0x20   :  { %639 = vmatpush.bf16.msra.mxu0 %v1251_v12  ;;  %v230_v32 = vunpack.c.l.b16 %v89_v28  ;;  %v231_v36 = vunpack.c.h.b16 %v89_v28  ;;  %v1285_v46 = vld [vmem:[#allocation5 + $0x130] sm:$0xff]  ;;  %v1284_v50 = vld [vmem:[#allocation5 + $0x128] sm:$0xff]  ;;  %v1283_v54 = vld [vmem:[#allocation5 + $0x120] sm:$0xff] }
  0x21   :  { %652 = vmatpush.bf16.msra.mxu1 %v1259_v13  ;;  %v1293_v47 = vld [vmem:[#allocation5 + $0x170] sm:$0xff]  ;;  %v1292_v51 = vld [vmem:[#allocation5 + $0x168] sm:$0xff]  ;;  %v1291_v55 = vld [vmem:[#allocation5 + $0x160] sm:$0xff] }
  0x22   :  { %665 = vmatpush.bf16.msra.mxu2 %v1267_v14  ;;  %v238_v42 = vpack.c.b16 %v230_v32, %v230_v32  ;;  %v239_v44 = vpack.c.b16 %v231_v36, %v231_v36  ;;  %v1301_v48 = vld [vmem:[#allocation5 + $0x1b0] sm:$0xff]  ;;  %v1300_v52 = vld [vmem:[#allocation5 + $0x1a8] sm:$0xff]  ;;  %v1299_v56 = vld [vmem:[#allocation5 + $0x1a0] sm:$0xff] }
  0x23   :  { %678 = vmatpush.bf16.msra.mxu3 %v1275_v15  ;;  %v1309_v49 = vld [vmem:[#allocation5 + $0x1f0] sm:$0xff]  ;;  %v1308_v53 = vld [vmem:[#allocation5 + $0x1e8] sm:$0xff]  ;;  %v1307_v57 = vld [vmem:[#allocation5 + $0x1e0] sm:$0xff] }
  0x24   :  { %640 = vmatpush.bf16.msra.mxu0 %v1250_v16  ;;  %v1282_v58 = vld [vmem:[#allocation5 + $0x118] sm:$0xff]  ;;  %v1281_v62 = vld [vmem:[#allocation5 + $0x110] sm:$0xff]  ;;  %v1280_v2 = vld [vmem:[#allocation5 + $0x108] sm:$0xff] }
  0x25   :  { %653 = vmatpush.bf16.msra.mxu1 %v1258_v17  ;;  %v1290_v59 = vld [vmem:[#allocation5 + $0x158] sm:$0xff]  ;;  %v1289_v63 = vld [vmem:[#allocation5 + $0x150] sm:$0xff]  ;;  %v1288_v3 = vld [vmem:[#allocation5 + $0x148] sm:$0xff] }
  0x26   :  { %666 = vmatpush.bf16.msra.mxu2 %v1266_v18  ;;  %v1298_v60 = vld [vmem:[#allocation5 + $0x198] sm:$0xff]  ;;  %v1297_v0 = vld [vmem:[#allocation5 + $0x190] sm:$0xff]  ;;  %v1296_v5 = vld [vmem:[#allocation5 + $0x188] sm:$0xff] }
  0x27   :  { %679 = vmatpush.bf16.msra.mxu3 %v1274_v19  ;;  %v1306_v61 = vld [vmem:[#allocation5 + $0x1d8] sm:$0xff]  ;;  %v1305_v1 = vld [vmem:[#allocation5 + $0x1d0] sm:$0xff]  ;;  %v1304_v6 = vld [vmem:[#allocation5 + $0x1c8] sm:$0xff] }
  0x28   :  { %641 = vmatpush.bf16.msra.mxu0 %v1249_v20  ;;  %v90_v4 = vld [vmem:[#allocation2 + $0x10] sm:$0xff]  ;;  %v91_v7 = vld [vmem:[#allocation2 + $0x18] sm:$0xff]  ;;  %v1279_v10 = vld [vmem:[#allocation5 + $0x100] sm:$0xff] }
  0x29   :  { %654 = vmatpush.bf16.msra.mxu1 %v1257_v21  ;;  %v232_v8 = vunpack.c.l.b16 %v90_v4  ;;  %v233_v9 = vunpack.c.h.b16 %v90_v4  ;;  %v1287_v11 = vld [vmem:[#allocation5 + $0x140] sm:$0xff]  ;;  %v234_v12 = vunpack.c.l.b16 %v91_v7  ;;  %v235_v13 = vunpack.c.h.b16 %v91_v7  ;;  %v1318_v20 = vld [vmem:[#allocation7 + $0x38] sm:$0xff]  ;;  %v1317_v21 = vld [vmem:[#allocation7 + $0x30] sm:$0xff] }
  0x2a   :  { %667 = vmatpush.bf16.msra.mxu2 %v1265_v22  ;;  %v1295_v14 = vld [vmem:[#allocation5 + $0x180] sm:$0xff]  ;;  %v1316_v22 = vld [vmem:[#allocation7 + $0x28] sm:$0xff] }
  0x2b   :  { %680 = vmatpush.bf16.msra.mxu3 %v1273_v23  ;;  %v1303_v15 = vld [vmem:[#allocation5 + $0x1c0] sm:$0xff]  ;;  %v240_v16 = vpack.c.b16 %v232_v8, %v232_v8  ;;  %v241_v17 = vpack.c.b16 %v233_v9, %v233_v9  ;;  %v242_v18 = vpack.c.b16 %v234_v12, %v234_v12  ;;  %v243_v19 = vpack.c.b16 %v235_v13, %v235_v13  ;;  %v1312_v28 = vld [vmem:[#allocation7 + $0x8] sm:$0xff] }
  0x2c   :  { %642 = vmatpush.bf16.msra.mxu0 %v1248_v24  ;;  %v1315_v23 = vld [vmem:[#allocation7 + $0x20] sm:$0xff]  ;;  %v1314_v24 = vld [vmem:[#allocation7 + $0x18] sm:$0xff] }
  0x2d   :  { %655 = vmatpush.bf16.msra.mxu1 %v1256_v25  ;;  %v1311_v32 = vld [vmem:[#allocation7] sm:$0xff] }
  0x2e   :  { %668 = vmatpush.bf16.msra.mxu2 %v1264_v26  ;;  %v1313_v26 = vld [vmem:[#allocation7 + $0x10] sm:$0xff] }
  0x2f   :  { %681 = vmatpush.bf16.msra.mxu3 %v1272_v27 }
  0x30   :  { %643 = vmatpush.bf16.msra.mxu0 %v1247_v30 }
  0x31   :  { %656 = vmatpush.bf16.msra.mxu1 %v1255_v31 }
  0x32   :  { %669 = vmatpush.bf16.msra.mxu2 %v1263_v34  ;;  %v1334_v34 = vld [vmem:[%s1538_s2] ss:$0 sm:$0xff] }
  0x33   :  { %682 = vmatpush.bf16.msra.mxu3 %v1271_v35  ;;  %644 = vmatmul.bf16.vlgmr.msra.gmra.mxu0 %v236_v43  ;;  %v1326_v35 = vld [vmem:[#allocation8 + $0x38] sm:$0xff] }
  0x34   :  { %688 = vmatpush.bf16.msrb.mxu0 %v1286_v38  ;;  %657 = vmatmul.bf16.vlgmr.msra.gmra.mxu1 %v237_v45  ;;  %v1325_v38 = vld [vmem:[#allocation8 + $0x30] sm:$0xff] }
  0x35   :  { %701 = vmatpush.bf16.msrb.mxu1 %v1294_v39  ;;  %670 = vmatmul.bf16.vlgmr.msra.gmra.mxu2 %v238_v42  ;;  %v1323_v42 = vld [vmem:[#allocation8 + $0x20] sm:$0xff] }
  0x36   :  { %714 = vmatpush.bf16.msrb.mxu2 %v1302_v40  ;;  %683 = vmatmul.bf16.vlgmr.msra.gmra.mxu3 %v239_v44  ;;  %v1324_v40 = vld [vmem:[#allocation8 + $0x28] sm:$0xff]  ;;  %v1322_v44 = vld [vmem:[#allocation8 + $0x18] sm:$0xff] }
  0x37   :  { %727 = vmatpush.bf16.msrb.mxu3 %v1310_v41 }
  0x38   :  { %689 = vmatpush.bf16.msrb.mxu0 %v1285_v46 }
  0x39   :  { %702 = vmatpush.bf16.msrb.mxu1 %v1293_v47 }
  0x3a   :  { %715 = vmatpush.bf16.msrb.mxu2 %v1301_v48 }
  0x3b   :  { %728 = vmatpush.bf16.msrb.mxu3 %v1309_v49  ;;  %v1321_v49 = vld [vmem:[#allocation8 + $0x10] sm:$0xff] }
  0x3c   :  { %690 = vmatpush.bf16.msrb.mxu0 %v1284_v50 }
  0x3d   :  { %703 = vmatpush.bf16.msrb.mxu1 %v1292_v51 }
  0x3e   :  { %716 = vmatpush.bf16.msrb.mxu2 %v1300_v52 }
  0x3f   :  { %729 = vmatpush.bf16.msrb.mxu3 %v1308_v53 }
  0x40   :  { %691 = vmatpush.bf16.msrb.mxu0 %v1283_v54 }
  0x41   :  { %704 = vmatpush.bf16.msrb.mxu1 %v1291_v55 }
  0x42   :  { %717 = vmatpush.bf16.msrb.mxu2 %v1299_v56 }
  0x43   :  { %730 = vmatpush.bf16.msrb.mxu3 %v1307_v57 }
  0x44   :  { %692 = vmatpush.bf16.msrb.mxu0 %v1282_v58 }
  0x45   :  { %705 = vmatpush.bf16.msrb.mxu1 %v1290_v59 }
  0x46   :  { %718 = vmatpush.bf16.msrb.mxu2 %v1298_v60 }
  0x47   :  { %731 = vmatpush.bf16.msrb.mxu3 %v1306_v61  ;;  %v1320_v61 = vld [vmem:[#allocation8 + $0x8] sm:$0xff] }
  0x48   :  { %693 = vmatpush.bf16.msrb.mxu0 %v1281_v62  ;;  %v1319_v62 = vld [vmem:[#allocation8] sm:$0xff] }
  0x49   :  { %706 = vmatpush.bf16.msrb.mxu1 %v1289_v63  ;;  %v1335_v63 = vld [vmem:[%s1540_s4] ss:$0 sm:$0xff] }
  0x4a   :  { %719 = vmatpush.bf16.msrb.mxu2 %v1297_v0 }
  0x4b   :  { %732 = vmatpush.bf16.msrb.mxu3 %v1305_v1 }
  0x4c   :  { %694 = vmatpush.bf16.msrb.mxu0 %v1280_v2 }
  0x4d   :  { %707 = vmatpush.bf16.msrb.mxu1 %v1288_v3 }
  0x4e   :  { %720 = vmatpush.bf16.msrb.mxu2 %v1296_v5  ;;  %v1336_v5 = vld [vmem:[%s1542_s6] ss:$0 sm:$0xff] }
  0x4f   :  { %733 = vmatpush.bf16.msrb.mxu3 %v1304_v6 }
  0x50   :  { %695 = vmatpush.bf16.msrb.mxu0 %v1279_v10 }
  0x51   :  { %708 = vmatpush.bf16.msrb.mxu1 %v1287_v11 }
  0x52   :  { %721 = vmatpush.bf16.msrb.mxu2 %v1295_v14 }
  0x53   :  { %734 = vmatpush.bf16.msrb.mxu3 %v1303_v15  ;;  %696 = vmatmul.bf16.vlgmr.msrb.gmra.mxu0 %v240_v16 }
  0x54   :  { %709 = vmatmul.bf16.vlgmr.msrb.gmra.mxu1 %v241_v17  ;;  %810 = vmatpush.bf16.msra.mxu0 %v1318_v20 }
  0x55   :  { %722 = vmatmul.bf16.vlgmr.msrb.gmra.mxu2 %v242_v18  ;;  %893 = vmatpush.bf16.msra.mxu1 %v1326_v35 }
  0x56   :  { %735 = vmatmul.bf16.vlgmr.msrb.gmra.mxu3 %v243_v19 }
  0x58   :  { %811 = vmatpush.bf16.msra.mxu0 %v1317_v21 }
  0x59   :  { %894 = vmatpush.bf16.msra.mxu1 %v1325_v38 }
  0x5c   :  { %812 = vmatpush.bf16.msra.mxu0 %v1316_v22 }
  0x5d   :  { %895 = vmatpush.bf16.msra.mxu1 %v1324_v40 }
  0x60   :  { %813 = vmatpush.bf16.msra.mxu0 %v1315_v23 }
  0x61   :  { %896 = vmatpush.bf16.msra.mxu1 %v1323_v42 }
  0x64   :  { %814 = vmatpush.bf16.msra.mxu0 %v1314_v24 }
  0x65   :  { %897 = vmatpush.bf16.msra.mxu1 %v1322_v44 }
  0x68   :  { %815 = vmatpush.bf16.msra.mxu0 %v1313_v26 }
  0x69   :  { %898 = vmatpush.bf16.msra.mxu1 %v1321_v49 }
  0x6c   :  { %816 = vmatpush.bf16.msra.mxu0 %v1312_v28 }
  0x6d   :  { %899 = vmatpush.bf16.msra.mxu1 %v1320_v61 }
  0x70   :  { %817 = vmatpush.bf16.msra.mxu0 %v1311_v32 }
  0x71   :  { %900 = vmatpush.bf16.msra.mxu1 %v1319_v62 }
  0xb0   :  { %v645_v25 = vpop.f32.mrf.mxu0 }
  0xb1   :  { %v658_v27 = vpop.f32.mrf.mxu1  ;;  %v646_v39 = vadd.f32 %v1334_v34, %v645_v25 }
  0xb3   :  { %v659_v41 = vadd.f32 %v658_v27, %v646_v39 }
  0xb8   :  { %v671_v29 = vpop.f32.mrf.mxu2  ;;  %v647_v31 = vpop.f32.mrf.mxu0 }
  0xb9   :  { %v684_v30 = vpop.f32.mrf.mxu3  ;;  %v660_v33 = vpop.f32.mrf.mxu1  ;;  %v672_v43 = vadd.f32 %v671_v29, %v659_v41 }
  0xbb   :  { %v685_v45 = vadd.f32 %v684_v30, %v672_v43 }
  0xc0   :  { %v673_v36 = vpop.f32.mrf.mxu2 }
  0xc1   :  { %v686_v37 = vpop.f32.mrf.mxu3 }
  0xd0   :  { %v697_v46 = vpop.f32.mrf.mxu0 }
  0xd1   :  { %v710_v47 = vpop.f32.mrf.mxu1  ;;  %v698_v48 = vadd.f32 %v697_v46, %v685_v45 }
  0xd3   :  { %v711_v50 = vadd.f32 %v710_v47, %v698_v48 }
  0xd8   :  { %v723_v51 = vpop.f32.mrf.mxu2  ;;  %v699_v54 = vpop.f32.mrf.mxu0 }
  0xd9   :  { %v736_v52 = vpop.f32.mrf.mxu3  ;;  %v724_v53 = vadd.f32 %v723_v51, %v711_v50  ;;  %v712_v55 = vpop.f32.mrf.mxu1 }
  0xdb   :  { %v737_v56 = vadd.f32 %v736_v52, %v724_v53 }
  0xdd   :  { %v740_v57 = vmax.f32 %v737_v56, 0.0 }
  0xdf   :  { %v741_v58 = vpack.c.bf16 %v740_v57, %v740_v57 }
  0xe0   :  { %v725_v59 = vpop.f32.mrf.mxu2 }
  0xe1   :  { %v738_v60 = vpop.f32.mrf.mxu3  ;;  %818 = vmatmul.bf16.vlgmr.msra.gmra.mxu0 %v741_v58 }
 0x15e   :  { %v819_v0 = vpop.f32.mrf.mxu0 }
 0x15f   :  { %v820_v1 = vadd.f32 %v1335_v63, %v819_v0 }
 0x161   :  { %v823_v2 = vmax.f32 %v820_v1, 0.0 }
 0x163   :  { %v824_v3 = vpack.c.bf16 %v823_v2, %v823_v2 }
 0x165   :  { %901 = vmatmul.bf16.vlgmr.msra.gmra.mxu1 %v824_v3 }
 0x166   :  { %v821_v4 = vpop.f32.mrf.mxu0 }
 0x1e2   :  { %v902_v6 = vpop.f32.mrf.mxu1 }
 0x1e3   :  { %v903_v7 = vadd.f32 %v1336_v5, %v902_v6 }
 0x1e5   :  { %v906_v8 = vmax.f32 %v903_v7, 0.0 }
 0x1e7   :  { %907 = vst [vmem:[#allocation10] sm:$0xff] %v906_v8 }
 0x1e8   :  { %918 = dma.vmem_to_hbm [thread:$0]  %s914_s25, 128, %s916_s28, [#allocation4]  }
 0x1ea   :  { %v904_v9 = vpop.f32.mrf.mxu1 }
 0x1eb   :  { %1463 = dma.done.wait [#allocation4], 128  }
 0x1ec   :  { %1464 = vsyncadd [#allocation4], 4294967168 }
 0x1ed   :  { %923 = vsyncpa [#allocation3], 1 }
 0x1ee   :  { %924 = vsyncpa [#allocation6], 1 }
 0x1ef   :  { %925 = vsyncpa [#allocation9], 1 }
 0x1f0   :  { %926 = vsyncpa [#allocation4], 1 }

</bundles_post_ra>
